<compile_context>
chip_gen: v7x
topology: tpu7x:2x2x1
jax: 0.10.0
libtpu: 0.0.40
codegen_flags: <defaults>
</compile_context>

<pallas_src>
import jax
import jax.numpy as jnp
from jax.experimental import pallas as pl
from jax.experimental.pallas import tpu as pltpu


def _round_up(x, m):
    return ((x + m - 1) // m) * m


def _stance_kernel(user_ref, news_ref, wu_ref, bu_ref, wn_ref, bn_ref,
                   red_ref, out_ref):
    # In-kernel bf16 cast of the f32 activation tiles (VPU, hidden under DMA).
    u_b = user_ref[...].astype(jnp.bfloat16)
    n_b = news_ref[...].astype(jnp.bfloat16)
    # Two bf16 MXU matmuls with f32 accumulation; bias add in f32.
    h_user = jnp.dot(u_b, wu_ref[...],
                     preferred_element_type=jnp.float32) + bu_ref[...]
    h_news = jnp.dot(n_b, wn_ref[...],
                     preferred_element_type=jnp.float32) + bn_ref[...]
    prod = (h_user * h_news).astype(jnp.bfloat16)             # (TN, S*H)
    # Segmented H-reduction + 1/sqrt(H) scale folded into one lane-dense
    # bf16 matmul against the constant (S*H, S) reduction matrix.
    out_ref[...] = jnp.dot(prod, red_ref[...],
                           preferred_element_type=jnp.float32
                           ).astype(out_ref.dtype)


def stance_classifier_forward(user, news, wu, bu, wn, bn,
                              num_stance, num_hidden, tile_n=4096):
    """user, news: (N, E) f32. wu, wn: (E, S*H) (pre-transposed). bu, bn: (1, S*H)."""
    n, e = user.shape
    sh = num_stance * num_hidden
    inv_norm = 1.0 / float(num_hidden) ** 0.5

    # Tiny, resident operands are prepared host-side.
    wu_b = wu.astype(jnp.bfloat16)
    wn_b = wn.astype(jnp.bfloat16)
    bu_f = bu.astype(jnp.float32).reshape(1, sh)
    bn_f = bn.astype(jnp.float32).reshape(1, sh)
    # Constant (S*H, S) reduction matrix: red[s*H + h, s] = 1/sqrt(H), as bf16.
    red = (jnp.repeat(jnp.eye(num_stance, dtype=jnp.float32),
                      num_hidden, axis=0) * inv_norm).astype(jnp.bfloat16)

    # ----- Generation-aware VMEM budget -------------------------------------
    try:
        phys_vmem = int(pltpu.get_tpu_info().vmem_capacity_bytes)
    except Exception:
        phys_vmem = 64 << 20            # conservative (v7x per-TC VMEM)
    vmem_cap = min(phys_vmem * 3 // 4, 100 << 20)   # ~48 MiB v7x, ~96 MiB v5e/v6e

    # Per-row dynamic VMEM: double-buffered f32 activation tiles (2 streams),
    # f32 intermediates, double-buffered output tile.
    per_row = (2 * 2 * e * 4) + (3 * sh * 4) + (2 * num_stance * 4)
    resident = 2 * e * sh * 2 + 2 * sh * 4 + sh * num_stance * 2
    max_tn = max(16, ((vmem_cap - resident) * 8 // 10) // per_row)
    max_tn = (max_tn // 16) * 16

    # ----- Batch tile selection (no padding; cdiv grid, evened tail) --------
    num_steps = max(1, pl.cdiv(n, int(tile_n)))
    tn = _round_up(pl.cdiv(n, num_steps), 16)
    tn = min(tn, max_tn)
    tn = min(tn, _round_up(n, 8))       # don't exceed the (rounded) batch
    tn = max(8, (tn // 8) * 8)
    grid = (pl.cdiv(n, tn),)

    act_spec = pl.BlockSpec((tn, e), lambda i: (i, 0))
    w_spec = pl.BlockSpec((e, sh), lambda i: (0, 0))            # resident
    b_spec = pl.BlockSpec((1, sh), lambda i: (0, 0))            # resident
    r_spec = pl.BlockSpec((sh, num_stance), lambda i: (0, 0))   # resident
    out_spec = pl.BlockSpec((tn, num_stance), lambda i: (i, 0))

    # Advisory cost hint for XLA scheduling around the custom call.
    flops = 4 * n * e * sh + 2 * n * sh * num_stance + 3 * n * sh
    bytes_accessed = (2 * n * e * 4          # f32 activation reads
                      + 2 * e * sh * 2 + 2 * sh * 4 + sh * num_stance * 2
                      + n * num_stance * 4)

    vmem_limit = int(min(max(int(1.25 * (per_row * tn + resident)), 32 << 20),
                         vmem_cap))

    out = pl.pallas_call(
        _stance_kernel,
        out_shape=jax.ShapeDtypeStruct((n, num_stance), jnp.float32),
        grid=grid,
        in_specs=[act_spec, act_spec, w_spec, b_spec, w_spec, b_spec, r_spec],
        out_specs=out_spec,
        compiler_params=pltpu.CompilerParams(
            dimension_semantics=("parallel",),
            vmem_limit_bytes=vmem_limit),
        cost_estimate=pl.CostEstimate(
            flops=int(flops), transcendentals=0,
            bytes_accessed=int(bytes_accessed)),
    )(user.astype(jnp.float32), news.astype(jnp.float32),
      wu_b, bu_f, wn_b, bn_f, red)

    return out


if __name__ == "__main__":
    # Small shapes consistent with the module.
    N = 8              # batch (user/news pairs)
    E = 32             # embedding_size
    S = 4              # num_stance
    H = 32             # num_hidden  -> S*H = 128 (lane aligned)

    key = jax.random.PRNGKey(0)
    k_u, k_n, k_wu, k_bu, k_wn, k_bn = jax.random.split(key, 6)

    user = jax.random.normal(k_u, (N, E), dtype=jnp.float32)
    news = jax.random.normal(k_n, (N, E), dtype=jnp.float32)

    # Deterministic "nn.Linear"-style params (stored transposed: (E, S*H)).
    scale = 1.0 / jnp.sqrt(jnp.float32(E))
    wu = jax.random.uniform(k_wu, (E, S * H), jnp.float32, -scale, scale)
    bu = jax.random.uniform(k_bu, (1, S * H), jnp.float32, -scale, scale)
    wn = jax.random.uniform(k_wn, (E, S * H), jnp.float32, -scale, scale)
    bn = jax.random.uniform(k_bn, (1, S * H), jnp.float32, -scale, scale)

    out = stance_classifier_forward(user, news, wu, bu, wn, bn, S, H)
    out = jax.block_until_ready(out)

    # Reference matching the kernel's bf16 MXU operand rounding (f32 accumulate).
    # NOTE: the true PyTorch reference is pure f32; bf16 operand rounding gives
    # ~1e-2 relative error, well within the tolerance below.
    u_b = user.astype(jnp.bfloat16).astype(jnp.float32)
    n_b = news.astype(jnp.bfloat16).astype(jnp.float32)
    wu_r = wu.astype(jnp.bfloat16).astype(jnp.float32)
    wn_r = wn.astype(jnp.bfloat16).astype(jnp.float32)
    h_user = u_b @ wu_r + bu
    h_news = n_b @ wn_r + bn
    ref = (h_user * h_news).reshape(N, S, H).sum(-1) / jnp.sqrt(jnp.float32(H))

    assert out.shape == (N, S)
    assert jnp.allclose(out, ref, atol=2e-2, rtol=2e-2), \
        float(jnp.max(jnp.abs(out - ref)))
    print("KERNEL_OK")
</pallas_src>

<mosaic_0001>
module attributes {stable_mosaic.version = 11 : i64} {
  func.func @_stance_kernel(%arg0: i32, %arg1: memref<8x32xf32, #tpu.memory_space<vmem>>, %arg2: memref<8x32xf32, #tpu.memory_space<vmem>>, %arg3: memref<32x128xbf16, #tpu.memory_space<vmem>>, %arg4: memref<1x128xf32, #tpu.memory_space<vmem>>, %arg5: memref<32x128xbf16, #tpu.memory_space<vmem>>, %arg6: memref<1x128xf32, #tpu.memory_space<vmem>>, %arg7: memref<128x4xbf16, #tpu.memory_space<vmem>>, %arg8: memref<8x4xf32, #tpu.memory_space<vmem>>) attributes {dimension_semantics = [#tpu.dimension_semantics<parallel>], iteration_bounds = array<i64: 1>, scalar_prefetch = 0 : i64, scratch_operands = 0 : i64, tpu.core_type = #tpu.core_type<tc>, window_params = [{transform_indices = @transform_0, window_bounds = array<i64: 8, 32>}, {transform_indices = @transform_1, window_bounds = array<i64: 8, 32>}, {pipeline_mode = #tpu.pipeline_mode<synchronous>, transform_indices = @transform_2, window_bounds = array<i64: 32, 128>}, {pipeline_mode = #tpu.pipeline_mode<synchronous>, transform_indices = @transform_3, window_bounds = array<i64: 1, 128>}, {pipeline_mode = #tpu.pipeline_mode<synchronous>, transform_indices = @transform_4, window_bounds = array<i64: 32, 128>}, {pipeline_mode = #tpu.pipeline_mode<synchronous>, transform_indices = @transform_5, window_bounds = array<i64: 1, 128>}, {pipeline_mode = #tpu.pipeline_mode<synchronous>, transform_indices = @transform_6, window_bounds = array<i64: 128, 4>}, {transform_indices = @transform_7, window_bounds = array<i64: 8, 4>}]} {
    %c0 = arith.constant 0 : index
    %c0_0 = arith.constant 0 : index
    %0 = vector.load %arg1[%c0, %c0_0] : memref<8x32xf32, #tpu.memory_space<vmem>>, vector<8x32xf32>
    %1 = arith.truncf %0 : vector<8x32xf32> to vector<8x32xbf16>
    %c0_1 = arith.constant 0 : index
    %c0_2 = arith.constant 0 : index
    %2 = vector.load %arg2[%c0_1, %c0_2] : memref<8x32xf32, #tpu.memory_space<vmem>>, vector<8x32xf32>
    %3 = arith.truncf %2 : vector<8x32xf32> to vector<8x32xbf16>
    %c0_3 = arith.constant 0 : index
    %c0_4 = arith.constant 0 : index
    %4 = vector.load %arg3[%c0_3, %c0_4] : memref<32x128xbf16, #tpu.memory_space<vmem>>, vector<32x128xbf16>
    %cst = arith.constant dense<0.000000e+00> : vector<8x128xf32>
    %5 = tpu.matmul %1, %4, %cst {dimension_numbers = #tpu.dot_dimension_numbers<[1], [0], [0], [1], [0, 0, 1, 1], [], []>} : vector<8x32xbf16>, vector<32x128xbf16>, vector<8x128xf32> -> vector<8x128xf32>
    %c0_5 = arith.constant 0 : index
    %c0_6 = arith.constant 0 : index
    %6 = vector.load %arg4[%c0_5, %c0_6] : memref<1x128xf32, #tpu.memory_space<vmem>>, vector<1x128xf32>
    %7 = vector.broadcast %6 : vector<1x128xf32> to vector<8x128xf32>
    %8 = arith.addf %5, %7 : vector<8x128xf32>
    %c0_7 = arith.constant 0 : index
    %c0_8 = arith.constant 0 : index
    %9 = vector.load %arg5[%c0_7, %c0_8] : memref<32x128xbf16, #tpu.memory_space<vmem>>, vector<32x128xbf16>
    %cst_9 = arith.constant dense<0.000000e+00> : vector<8x128xf32>
    %10 = tpu.matmul %3, %9, %cst_9 {dimension_numbers = #tpu.dot_dimension_numbers<[1], [0], [0], [1], [0, 0, 1, 1], [], []>} : vector<8x32xbf16>, vector<32x128xbf16>, vector<8x128xf32> -> vector<8x128xf32>
    %c0_10 = arith.constant 0 : index
    %c0_11 = arith.constant 0 : index
    %11 = vector.load %arg6[%c0_10, %c0_11] : memref<1x128xf32, #tpu.memory_space<vmem>>, vector<1x128xf32>
    %12 = vector.broadcast %11 : vector<1x128xf32> to vector<8x128xf32>
    %13 = arith.addf %10, %12 : vector<8x128xf32>
    %14 = arith.mulf %8, %13 : vector<8x128xf32>
    %15 = arith.truncf %14 : vector<8x128xf32> to vector<8x128xbf16>
    %c0_12 = arith.constant 0 : index
    %c0_13 = arith.constant 0 : index
    %16 = vector.load %arg7[%c0_12, %c0_13] : memref<128x4xbf16, #tpu.memory_space<vmem>>, vector<128x4xbf16>
    %cst_14 = arith.constant dense<0.000000e+00> : vector<8x4xf32>
    %17 = tpu.matmul %15, %16, %cst_14 {dimension_numbers = #tpu.dot_dimension_numbers<[1], [0], [0], [1], [0, 0, 1, 1], [], []>} : vector<8x128xbf16>, vector<128x4xbf16>, vector<8x4xf32> -> vector<8x4xf32>
    %c0_15 = arith.constant 0 : index
    %c0_16 = arith.constant 0 : index
    %18 = vector.load %arg8[%c0_15, %c0_16] : memref<8x4xf32, #tpu.memory_space<vmem>>, vector<8x4xf32>
    tpu.vector_store %arg8[%c0_15, %c0_16], %17 {strides = array<i32>} : memref<8x4xf32, #tpu.memory_space<vmem>>, vector<8x4xf32>,
    return
  }
  func.func @transform_0(%arg0: i32) -> (i32, i32) {
    %c0_i32 = arith.constant 0 : i32
    %c0_i32_0 = arith.constant 0 : i32
    return %arg0, %c0_i32 : i32, i32
  }
  func.func @transform_1(%arg0: i32) -> (i32, i32) {
    %c0_i32 = arith.constant 0 : i32
    %c0_i32_0 = arith.constant 0 : i32
    return %arg0, %c0_i32 : i32, i32
  }
  func.func @transform_2(%arg0: i32) -> (i32, i32) {
    %c0_i32 = arith.constant 0 : i32
    %c0_i32_0 = arith.constant 0 : i32
    %c0_i32_1 = arith.constant 0 : i32
    return %c0_i32, %c0_i32_0 : i32, i32
  }
  func.func @transform_3(%arg0: i32) -> (i32, i32) {
    %c0_i32 = arith.constant 0 : i32
    %c0_i32_0 = arith.constant 0 : i32
    %c0_i32_1 = arith.constant 0 : i32
    return %c0_i32, %c0_i32_0 : i32, i32
  }
  func.func @transform_4(%arg0: i32) -> (i32, i32) {
    %c0_i32 = arith.constant 0 : i32
    %c0_i32_0 = arith.constant 0 : i32
    %c0_i32_1 = arith.constant 0 : i32
    return %c0_i32, %c0_i32_0 : i32, i32
  }
  func.func @transform_5(%arg0: i32) -> (i32, i32) {
    %c0_i32 = arith.constant 0 : i32
    %c0_i32_0 = arith.constant 0 : i32
    %c0_i32_1 = arith.constant 0 : i32
    return %c0_i32, %c0_i32_0 : i32, i32
  }
  func.func @transform_6(%arg0: i32) -> (i32, i32) {
    %c0_i32 = arith.constant 0 : i32
    %c0_i32_0 = arith.constant 0 : i32
    %c0_i32_1 = arith.constant 0 : i32
    return %c0_i32, %c0_i32_0 : i32, i32
  }
  func.func @transform_7(%arg0: i32) -> (i32, i32) {
    %c0_i32 = arith.constant 0 : i32
    %c0_i32_0 = arith.constant 0 : i32
    return %arg0, %c0_i32 : i32, i32
  }
}

</mosaic_0001>

<bundles_post_ra>
// kernel: tpu_custom_call.1
= control target key start
LH: loop header
LB: loop body
LE: loop exit
PB: predicated region body
PF: predicated region fallthrough
CT: control target
= control target key end

     0   :  { %v357_v0 = vmov 0.0   ;;  %vm358_vm0 = vmmov 0   ;;  %vm54_vm1 = vcmask 261120   ;;  %vm270_vm2 = vcmask 31744   ;;  %s455_s2 = inlined_call_operand.vmem [shape: bf16[32,128], index: 2, kind: input, shape index: {}]   ;;  %s456_s0 = inlined_call_operand.vmem [shape: f32[8,32], index: 0, kind: input, shape index: {}]   ;;  %s457_s4 = inlined_call_operand.vmem [shape: bf16[32,128], index: 4, kind: input, shape index: {}]   ;;  %s458_s6 = inlined_call_operand.vmem [shape: bf16[128,4], index: 6, kind: input, shape index: {}]   ;;  %s459_s1 = inlined_call_operand.vmem [shape: f32[8,32], index: 1, kind: input, shape index: {}]   ;;  %s460_s3 = inlined_call_operand.vmem [shape: f32[1,128], index: 3, kind: input, shape index: {}]   ;;  %s461_s5 = inlined_call_operand.vmem [shape: f32[1,128], index: 5, kind: input, shape index: {}]   ;;  %s462_s7 = inlined_call_operand.vmem [shape: f32[8,4], index: 7, kind: output, shape index: {}]  }
   0x1   :  { %307 = vmatprep.subr.bf16.mxu1 %v357_v0  ;;  %v345_v1 = vld [vmem:[%s455_s2] sm:$0xff]   ;;  %311 = vmatprep.mubr.msk.bf16.mxu1 %vm358_vm0, %v357_v0  ;;  %v346_v2 = vld [vmem:[%s455_s2 + $0x8] sm:$0xff]   ;;  %v351_v10 = vld [vmem:[%s458_s6 + $0x10] sm:$0xff]  }
   0x2   :  { %323 = vmatprep.subr.bf16.mxu0 %v357_v0  ;;  %339 = vmatprep.mubr.msk.bf16.mxu0 %vm358_vm0, %v357_v0  ;;  %v27_v3 = vld [vmem:[%s456_s0] sm:$0xff]  ;;  %v350_v7 = vld [vmem:[%s458_s6 + $0x8] sm:$0xff]   ;;  %v352_v12 = vld [vmem:[%s458_s6 + $0x18] sm:$0xff]  }
   0x3   :  { %308 = vmatpush3.bf16.msra.mxu1 %v345_v1  ;;  %v28_v4 = vpack.c.bf16 %v27_v3, %v27_v3  ;;  %v349_v5 = vld [vmem:[%s458_s6] sm:$0xff]   ;;  %v348_v8 = vld [vmem:[%s457_s4 + $0x8] sm:$0xff]   ;;  %v355_v15 = vld [vmem:[%s458_s6 + $0x30] sm:$0xff]  }
   0x4   :  { %309 = vmatprep.subr.bf16.mxu1 %v357_v0  ;;  %v347_v6 = vld [vmem:[%s457_s4] sm:$0xff]   ;;  %324 = vmatpush3.bf16.msra.mxu0 %v349_v5  ;;  %v354_v14 = vld [vmem:[%s458_s6 + $0x28] sm:$0xff]   ;;  %v356_v16 = vld [vmem:[%s458_s6 + $0x38] sm:$0xff]  }
   0x5   :  { %v29_v9 = vld [vmem:[%s459_s1] sm:$0xff]  ;;  %325 = vmatprep.subr.bf16.mxu0 %v357_v0 }
   0x6   :  { %v30_v11 = vpack.c.bf16 %v29_v9, %v29_v9  ;;  %v353_v13 = vld [vmem:[%s458_s6 + $0x20] sm:$0xff]  }
   0x7   :  { %310 = vmatpush3.bf16.msra.mxu1 %v346_v2  ;;  %v276_v21 = vld [vmem:[%s460_s3] ss:$0 sm:$0xff] }
   0x8   :  { %315 = vmatprep.subr.bf16.mxu1 %v357_v0  ;;  %326 = vmatpush3.bf16.msra.mxu0 %v350_v7  ;;  %v280_v22 = vld [vmem:[%s461_s5] ss:$0 sm:$0xff] }
   0x9   :  { %327 = vmatprep.subr.bf16.mxu0 %v357_v0 }
   0xa   :  { %312 = vmatmul.mubr.msk.bf16.vlgmr.msra.gmra.mrb[0].mxu1 %vm54_vm1, %v28_v4 }
   0xb   :  { %316 = vmatpush3.bf16.msra.mxu1 %v347_v6  ;;  %319 = vmatprep.mubr.msk.bf16.mxu1 %vm358_vm0, %v357_v0 }
   0xc   :  { %317 = vmatprep.subr.bf16.mxu1 %v357_v0  ;;  %328 = vmatpush3.bf16.msra.mxu0 %v351_v10 }
   0xd   :  { %329 = vmatprep.subr.bf16.mxu0 %v357_v0 }
   0xf   :  { %318 = vmatpush3.bf16.msra.mxu1 %v348_v8 }
  0x10   :  { %330 = vmatpush3.bf16.msra.mxu0 %v352_v12 }
  0x11   :  { %331 = vmatprep.subr.bf16.mxu0 %v357_v0 }
  0x12   :  { %320 = vmatmul.mubr.msk.bf16.vlgmr.msra.gmra.mrb[4].mxu1 %vm54_vm1, %v30_v11 }
  0x14   :  { %332 = vmatpush3.bf16.msra.mxu0 %v353_v13 }
  0x15   :  { %333 = vmatprep.subr.bf16.mxu0 %v357_v0 }
  0x18   :  { %334 = vmatpush3.bf16.msra.mxu0 %v354_v14 }
  0x19   :  { %335 = vmatprep.subr.bf16.mxu0 %v357_v0 }
  0x1c   :  { %336 = vmatpush3.bf16.msra.mxu0 %v355_v15 }
  0x1d   :  { %337 = vmatprep.subr.bf16.mxu0 %v357_v0 }
  0x20   :  { %338 = vmatpush3.bf16.msra.mxu0 %v356_v16 }
  0xdd   :  { %v92_v17 = vpop.f32.mrb[0].mxu1 }
  0xde   :  { %v313_v18 = vpop.f32.mrb[1].mxu1  ;;  %v93_v24 = vadd.f32 %v276_v21, %v92_v17 }
  0xdf   :  { %v95_v19 = vpop.f32.mrb[2].mxu1 }
  0xe0   :  { %v314_v20 = vpop.f32.mrb[3].mxu1 }
  0xe5   :  { %v158_v23 = vpop.f32.mrb[4].mxu1 }
  0xe6   :  { %v159_v25 = vadd.f32 %v280_v22, %v158_v23  ;;  %v321_v26 = vpop.f32.mrb[5].mxu1 }
  0xe7   :  { %v161_v27 = vpop.f32.mrb[6].mxu1 }
  0xe8   :  { %v164_v28 = vmul.f32 %v159_v25, %v93_v24  ;;  %v322_v29 = vpop.f32.mrb[7].mxu1 }
  0xea   :  { %v165_v30 = vpack.c.bf16 %v164_v28, %v164_v28 }
  0xec   :  { %340 = vmatmul.mubr.bf16.vlgmr.msra.gmra.mrb[0].mxu0 %v165_v30 }
 0x1bf   :  { %v264_v31 = vpop.f32.mrb[0].mxu0 }
 0x1c0   :  { %271 = vst.msk [vmem:[%s462_s7] sm:$0xff] %vm270_vm2, %v264_v31  ;;  %v341_v32 = vpop.f32.mrb[1].mxu0 }
 0x1c1   :  { %v267_v33 = vpop.f32.mrb[2].mxu0 }
 0x1c2   :  { %v342_v34 = vpop.f32.mrb[3].mxu0 }

</bundles_post_ra>
